<compile_context>
chip_gen: v6e
topology: v6e:2x2x1
jax: 0.10.0
libtpu: 0.0.40
codegen_flags: <defaults>
</compile_context>

<pallas_src>
import functools

import jax
import jax.numpy as jnp
from jax.experimental import pallas as pl
from jax.experimental.pallas import tpu as pltpu


def _ae_kernel(x_ref, w1_ref, b1_ref, w23_ref, b23_ref, w4_ref, b4_ref, o_ref):
    """Full AE forward for one (packed) batch tile, entirely in VMEM.

    h1 = relu(x @ W1 + b1)
    h2 = relu(h1 @ W23 + b23)        # fused (enc Linear2 o dec Linear1)
    y  = h2 @ W4 + b4
    Matmul operands are bf16, accumulation and epilogue are f32.
    """
    x = x_ref[...].astype(jnp.bfloat16)

    h1 = jnp.dot(x, w1_ref[...], preferred_element_type=jnp.float32) + b1_ref[...]
    h1 = jnp.maximum(h1, 0.0)                                   # ReLU (VPU, f32)

    h2 = jnp.dot(h1.astype(jnp.bfloat16), w23_ref[...],
                 preferred_element_type=jnp.float32) + b23_ref[...]
    h2 = jnp.maximum(h2, 0.0)                                   # ReLU (VPU, f32)

    y = jnp.dot(h2.astype(jnp.bfloat16), w4_ref[...],
                preferred_element_type=jnp.float32) + b4_ref[...]
    o_ref[...] = y.astype(o_ref.dtype)


def _round_up(x, m):
    return ((x + m - 1) // m) * m


@functools.partial(jax.jit, static_argnames=("block_b", "pack"))
def ae_forward(x, params, *, block_b=8192, pack=4):
    """x: (B, d0).  params: dict of pre-transposed weights (in, out), biases (1, out).

    block_b: approximate number of samples per grid step.
    pack:    samples packed per row via block-diagonal weights (4 fills the
             256-wide MXU on v6e/v7x; 2 is enough on v5e).
    """
    B, d0 = x.shape
    w1, b1 = params["w1"], params["b1"]   # (d0, d1), (1, d1)
    w2, b2 = params["w2"], params["b2"]   # (d1, d2), (1, d2)
    w3, b3 = params["w3"], params["b3"]   # (d2, d1), (1, d1)
    w4, b4 = params["w4"], params["b4"]   # (d1, d0), (1, d0)
    d1 = w1.shape[1]
    p = max(1, int(pack))

    f32, bf16 = jnp.float32, jnp.bfloat16

    # --- Algebraic fusion of the two middle Linears (no ReLU in between). ---
    w23 = jnp.dot(w2.astype(f32), w3.astype(f32), preferred_element_type=f32)      # (d1, d1)
    b23 = jnp.dot(b2.astype(f32), w3.astype(f32), preferred_element_type=f32) \
        + b3.astype(f32)                                                            # (1, d1)

    # --- Block-diagonal sample packing: p samples per row, lane-dense I/O. ---
    eye = jnp.eye(p, dtype=f32)
    w1_bd = jnp.kron(eye, w1.astype(f32)).astype(bf16)      # (p*d0, p*d1)
    w23_bd = jnp.kron(eye, w23).astype(bf16)                 # (p*d1, p*d1)
    w4_bd = jnp.kron(eye, w4.astype(f32)).astype(bf16)       # (p*d1, p*d0)
    b1_bd = jnp.tile(b1.astype(f32), (1, p))                 # (1, p*d1)
    b23_bd = jnp.tile(b23, (1, p))                           # (1, p*d1)
    b4_bd = jnp.tile(b4.astype(f32), (1, p))                 # (1, p*d0)

    # Pad batch so the packed row count is a multiple of 8 (sublane granularity).
    B_pad = _round_up(B, 8 * p)
    xp = jnp.pad(x, ((0, B_pad - B), (0, 0))) if B_pad != B else x
    R = B_pad // p
    row_w = p * d0
    xr = xp.reshape(R, row_w)

    # --- Row tile: big (amortize per-step overhead), multiple of 8, and
    #     capped so the grid has >=2 steps when possible (v7x: 2 TensorCores).
    block_rows = max(8, _round_up(block_b // p, 8))
    two_step = max(8, _round_up(pl.cdiv(R, 2), 8))
    tile_r = min(block_rows, two_step, _round_up(R, 8))
    grid = (pl.cdiv(R, tile_r),)

    # --- VMEM budget: x/out double-buffered; weights resident (constant
    #     index_map -> fetched once); f32 intermediates h1/h2/y per tile.
    io_item = jnp.dtype(x.dtype).itemsize
    io_bytes = 2 * 2 * tile_r * row_w * io_item                   # x + out, 2 buffers each
    act_bytes = tile_r * (2 * p * d1 + p * d0) * 4                # h1, h2, y (f32)
    w_bytes = 2 * (p * d0 * p * d1 + p * d1 * p * d1 + p * d1 * p * d0) \
        + 4 * (2 * p * d1 + p * d0)                               # bf16 weights + f32 biases
    vmem_limit = int(min(max(int(1.5 * (io_bytes + act_bytes + w_bytes)), 16 << 20),
                         48 << 20))                               # headroom on v7x (64 MiB/TC)

    # Advisory cost estimate (actual block-diagonal MXU work + HBM stream of x/y).
    flops = 2 * R * (p * d0 * p * d1 + p * d1 * p * d1 + p * d1 * p * d0)
    bytes_accessed = 2 * R * row_w * io_item + w_bytes
    cost = pl.CostEstimate(flops=flops, transcendentals=0, bytes_accessed=bytes_accessed)

    out = pl.pallas_call(
        _ae_kernel,
        out_shape=jax.ShapeDtypeStruct((R, row_w), x.dtype),
        grid=grid,
        in_specs=[
            pl.BlockSpec((tile_r, row_w), lambda i: (i, 0)),          # packed x tile
            pl.BlockSpec((p * d0, p * d1), lambda i: (0, 0)),         # W1 (block-diag)
            pl.BlockSpec((1, p * d1), lambda i: (0, 0)),              # b1
            pl.BlockSpec((p * d1, p * d1), lambda i: (0, 0)),         # W23 (fused, block-diag)
            pl.BlockSpec((1, p * d1), lambda i: (0, 0)),              # b23
            pl.BlockSpec((p * d1, p * d0), lambda i: (0, 0)),         # W4 (block-diag)
            pl.BlockSpec((1, p * d0), lambda i: (0, 0)),              # b4
        ],
        out_specs=pl.BlockSpec((tile_r, row_w), lambda i: (i, 0)),
        compiler_params=pltpu.CompilerParams(
            dimension_semantics=("parallel",),
            vmem_limit_bytes=vmem_limit),
        cost_estimate=cost,
    )(xr, w1_bd, b1_bd, w23_bd, b23_bd, w4_bd, b4_bd)

    y = out.reshape(B_pad, d0)
    return y[:B] if B_pad != B else y


def init_params(key, d0, d1, d2, dtype=jnp.float32):
    """Deterministic synthetic parameters, stored pre-transposed as (in, out)."""
    keys = jax.random.split(key, 8)

    def linear(kw, kb, fan_in, fan_out):
        # Mimic PyTorch's uniform(-1/sqrt(fan_in), 1/sqrt(fan_in)) init.
        bound = 1.0 / jnp.sqrt(jnp.asarray(fan_in, jnp.float32))
        w = jax.random.uniform(kw, (fan_in, fan_out), dtype, -bound, bound)
        b = jax.random.uniform(kb, (1, fan_out), dtype, -bound, bound)
        return w, b

    w1, b1 = linear(keys[0], keys[1], d0, d1)   # encoder Linear(d0 -> d1)
    w2, b2 = linear(keys[2], keys[3], d1, d2)   # encoder Linear(d1 -> d2)
    w3, b3 = linear(keys[4], keys[5], d2, d1)   # decoder Linear(d2 -> d1)
    w4, b4 = linear(keys[6], keys[7], d1, d0)   # decoder Linear(d1 -> d0)
    return dict(w1=w1, b1=b1, w2=w2, b2=b2, w3=w3, b3=b3, w4=w4, b4=b4)


def ae_reference(x, p):
    """Pure-JAX f32 reference mirroring the (unfused) PyTorch forward."""
    h = jnp.maximum(x @ p["w1"] + p["b1"], 0.0)
    z = h @ p["w2"] + p["b2"]
    h = jnp.maximum(z @ p["w3"] + p["b3"], 0.0)
    return h @ p["w4"] + p["b4"]


def ae_reference_matched(x, p):
    """Reference replicating the kernel's numerics (fused W23, bf16 operands,
    f32 accumulation) — used for a tight correctness check of the packing/tiling."""
    f32, bf16 = jnp.float32, jnp.bfloat16
    w23 = jnp.dot(p["w2"].astype(f32), p["w3"].astype(f32), preferred_element_type=f32)
    b23 = jnp.dot(p["b2"].astype(f32), p["w3"].astype(f32), preferred_element_type=f32) \
        + p["b3"].astype(f32)
    h = jnp.dot(x.astype(bf16), p["w1"].astype(bf16),
                preferred_element_type=f32) + p["b1"].astype(f32)
    h = jnp.maximum(h, 0.0)
    h = jnp.dot(h.astype(bf16), w23.astype(bf16), preferred_element_type=f32) + b23
    h = jnp.maximum(h, 0.0)
    return jnp.dot(h.astype(bf16), p["w4"].astype(bf16),
                   preferred_element_type=f32) + p["b4"].astype(f32)


if __name__ == "__main__":
    # Small shapes consistent with AE(shapes=[64, 32, 16]).
    d0, d1, d2 = 64, 32, 16
    key = jax.random.PRNGKey(0)
    kx, kp, kx2 = jax.random.split(key, 3)
    params = init_params(kp, d0, d1, d2)

    # Case 1: tiny demo batch (single grid step, pack=4 -> lane-dense 256 row).
    B = 8
    x = jax.random.normal(kx, (B, d0), jnp.float32)
    out = jax.block_until_ready(ae_forward(x, params))
    assert out.shape == (B, d0), out.shape
    ref_m = ae_reference_matched(x, params)
    ref_f = ae_reference(x, params)
    # Tight check vs numerics-matched reference (validates packing/fusion/tiling).
    assert jnp.allclose(out, ref_m, atol=2e-4, rtol=2e-4), "mismatch vs matched reference (B=8)"
    # Dtype-aware loose check vs the pure-f32 PyTorch-equivalent reference.
    assert jnp.allclose(out, ref_f, atol=3e-2, rtol=3e-2), "mismatch vs f32 reference (B=8)"

    # Case 2: batch padding + multi-step grid + clipped last tile (pack=4, small tile).
    B2 = 100
    x2 = jax.random.normal(kx2, (B2, d0), jnp.float32)
    out2 = jax.block_until_ready(ae_forward(x2, params, block_b=64, pack=4))
    assert out2.shape == (B2, d0), out2.shape
    assert jnp.allclose(out2, ae_reference_matched(x2, params), atol=2e-4, rtol=2e-4), \
        "mismatch vs matched reference (B=100)"
    assert jnp.allclose(out2, ae_reference(x2, params), atol=3e-2, rtol=3e-2), \
        "mismatch vs f32 reference (B=100)"

    # Case 3: pack=2 path (v5e-style configuration, 128-lane rows).
    out3 = jax.block_until_ready(ae_forward(x2, params, block_b=32, pack=2))
    assert out3.shape == (B2, d0), out3.shape
    assert jnp.allclose(out3, ae_reference_matched(x2, params), atol=2e-4, rtol=2e-4), \
        "mismatch vs matched reference (pack=2)"

    print("KERNEL_OK")
</pallas_src>

<mosaic_0001>
module attributes {stable_mosaic.version = 11 : i64} {
  func.func @_ae_kernel(%arg0: i32, %arg1: memref<8x256xf32, #tpu.memory_space<vmem>>, %arg2: memref<256x128xbf16, #tpu.memory_space<vmem>>, %arg3: memref<1x128xf32, #tpu.memory_space<vmem>>, %arg4: memref<128x128xbf16, #tpu.memory_space<vmem>>, %arg5: memref<1x128xf32, #tpu.memory_space<vmem>>, %arg6: memref<128x256xbf16, #tpu.memory_space<vmem>>, %arg7: memref<1x256xf32, #tpu.memory_space<vmem>>, %arg8: memref<8x256xf32, #tpu.memory_space<vmem>>) attributes {dimension_semantics = [#tpu.dimension_semantics<parallel>], iteration_bounds = array<i64: 1>, scalar_prefetch = 0 : i64, scratch_operands = 0 : i64, tpu.core_type = #tpu.core_type<tc>, window_params = [{transform_indices = @transform_0, window_bounds = array<i64: 8, 256>}, {pipeline_mode = #tpu.pipeline_mode<synchronous>, transform_indices = @transform_1, window_bounds = array<i64: 256, 128>}, {pipeline_mode = #tpu.pipeline_mode<synchronous>, transform_indices = @transform_2, window_bounds = array<i64: 1, 128>}, {pipeline_mode = #tpu.pipeline_mode<synchronous>, transform_indices = @transform_3, window_bounds = array<i64: 128, 128>}, {pipeline_mode = #tpu.pipeline_mode<synchronous>, transform_indices = @transform_4, window_bounds = array<i64: 1, 128>}, {pipeline_mode = #tpu.pipeline_mode<synchronous>, transform_indices = @transform_5, window_bounds = array<i64: 128, 256>}, {pipeline_mode = #tpu.pipeline_mode<synchronous>, transform_indices = @transform_6, window_bounds = array<i64: 1, 256>}, {transform_indices = @transform_7, window_bounds = array<i64: 8, 256>}]} {
    %c0 = arith.constant 0 : index
    %c0_0 = arith.constant 0 : index
    %0 = vector.load %arg1[%c0, %c0_0] : memref<8x256xf32, #tpu.memory_space<vmem>>, vector<8x256xf32>
    %1 = arith.truncf %0 : vector<8x256xf32> to vector<8x256xbf16>
    %c0_1 = arith.constant 0 : index
    %c0_2 = arith.constant 0 : index
    %2 = vector.load %arg2[%c0_1, %c0_2] : memref<256x128xbf16, #tpu.memory_space<vmem>>, vector<256x128xbf16>
    %cst = arith.constant dense<0.000000e+00> : vector<8x128xf32>
    %3 = tpu.matmul %1, %2, %cst {dimension_numbers = #tpu.dot_dimension_numbers<[1], [0], [0], [1], [0, 0, 1, 1], [], []>} : vector<8x256xbf16>, vector<256x128xbf16>, vector<8x128xf32> -> vector<8x128xf32>
    %c0_3 = arith.constant 0 : index
    %c0_4 = arith.constant 0 : index
    %4 = vector.load %arg3[%c0_3, %c0_4] : memref<1x128xf32, #tpu.memory_space<vmem>>, vector<1x128xf32>
    %5 = vector.broadcast %4 : vector<1x128xf32> to vector<8x128xf32>
    %6 = arith.addf %3, %5 : vector<8x128xf32>
    %cst_5 = arith.constant 0.000000e+00 : f32
    %7 = vector.broadcast %cst_5 : f32 to vector<8x128xf32>
    %8 = arith.maximumf %6, %7 : vector<8x128xf32>
    %9 = arith.truncf %8 : vector<8x128xf32> to vector<8x128xbf16>
    %c0_6 = arith.constant 0 : index
    %c0_7 = arith.constant 0 : index
    %10 = vector.load %arg4[%c0_6, %c0_7] : memref<128x128xbf16, #tpu.memory_space<vmem>>, vector<128x128xbf16>
    %cst_8 = arith.constant dense<0.000000e+00> : vector<8x128xf32>
    %11 = tpu.matmul %9, %10, %cst_8 {dimension_numbers = #tpu.dot_dimension_numbers<[1], [0], [0], [1], [0, 0, 1, 1], [], []>} : vector<8x128xbf16>, vector<128x128xbf16>, vector<8x128xf32> -> vector<8x128xf32>
    %c0_9 = arith.constant 0 : index
    %c0_10 = arith.constant 0 : index
    %12 = vector.load %arg5[%c0_9, %c0_10] : memref<1x128xf32, #tpu.memory_space<vmem>>, vector<1x128xf32>
    %13 = vector.broadcast %12 : vector<1x128xf32> to vector<8x128xf32>
    %14 = arith.addf %11, %13 : vector<8x128xf32>
    %cst_11 = arith.constant 0.000000e+00 : f32
    %15 = vector.broadcast %cst_11 : f32 to vector<8x128xf32>
    %16 = arith.maximumf %14, %15 : vector<8x128xf32>
    %17 = arith.truncf %16 : vector<8x128xf32> to vector<8x128xbf16>
    %c0_12 = arith.constant 0 : index
    %c0_13 = arith.constant 0 : index
    %18 = vector.load %arg6[%c0_12, %c0_13] : memref<128x256xbf16, #tpu.memory_space<vmem>>, vector<128x256xbf16>
    %cst_14 = arith.constant dense<0.000000e+00> : vector<8x256xf32>
    %19 = tpu.matmul %17, %18, %cst_14 {dimension_numbers = #tpu.dot_dimension_numbers<[1], [0], [0], [1], [0, 0, 1, 1], [], []>} : vector<8x128xbf16>, vector<128x256xbf16>, vector<8x256xf32> -> vector<8x256xf32>
    %c0_15 = arith.constant 0 : index
    %c0_16 = arith.constant 0 : index
    %20 = vector.load %arg7[%c0_15, %c0_16] : memref<1x256xf32, #tpu.memory_space<vmem>>, vector<1x256xf32>
    %21 = vector.broadcast %20 : vector<1x256xf32> to vector<8x256xf32>
    %22 = arith.addf %19, %21 : vector<8x256xf32>
    %c0_17 = arith.constant 0 : index
    %c0_18 = arith.constant 0 : index
    %23 = vector.load %arg8[%c0_17, %c0_18] : memref<8x256xf32, #tpu.memory_space<vmem>>, vector<8x256xf32>
    tpu.vector_store %arg8[%c0_17, %c0_18], %22 {strides = array<i32>} : memref<8x256xf32, #tpu.memory_space<vmem>>, vector<8x256xf32>,
    return
  }
  func.func @transform_0(%arg0: i32) -> (i32, i32) {
    %c0_i32 = arith.constant 0 : i32
    %c0_i32_0 = arith.constant 0 : i32
    return %arg0, %c0_i32 : i32, i32
  }
  func.func @transform_1(%arg0: i32) -> (i32, i32) {
    %c0_i32 = arith.constant 0 : i32
    %c0_i32_0 = arith.constant 0 : i32
    %c0_i32_1 = arith.constant 0 : i32
    return %c0_i32, %c0_i32_0 : i32, i32
  }
  func.func @transform_2(%arg0: i32) -> (i32, i32) {
    %c0_i32 = arith.constant 0 : i32
    %c0_i32_0 = arith.constant 0 : i32
    %c0_i32_1 = arith.constant 0 : i32
    return %c0_i32, %c0_i32_0 : i32, i32
  }
  func.func @transform_3(%arg0: i32) -> (i32, i32) {
    %c0_i32 = arith.constant 0 : i32
    %c0_i32_0 = arith.constant 0 : i32
    %c0_i32_1 = arith.constant 0 : i32
    return %c0_i32, %c0_i32_0 : i32, i32
  }
  func.func @transform_4(%arg0: i32) -> (i32, i32) {
    %c0_i32 = arith.constant 0 : i32
    %c0_i32_0 = arith.constant 0 : i32
    %c0_i32_1 = arith.constant 0 : i32
    return %c0_i32, %c0_i32_0 : i32, i32
  }
  func.func @transform_5(%arg0: i32) -> (i32, i32) {
    %c0_i32 = arith.constant 0 : i32
    %c0_i32_0 = arith.constant 0 : i32
    %c0_i32_1 = arith.constant 0 : i32
    return %c0_i32, %c0_i32_0 : i32, i32
  }
  func.func @transform_6(%arg0: i32) -> (i32, i32) {
    %c0_i32 = arith.constant 0 : i32
    %c0_i32_0 = arith.constant 0 : i32
    %c0_i32_1 = arith.constant 0 : i32
    return %c0_i32, %c0_i32_0 : i32, i32
  }
  func.func @transform_7(%arg0: i32) -> (i32, i32) {
    %c0_i32 = arith.constant 0 : i32
    %c0_i32_0 = arith.constant 0 : i32
    return %arg0, %c0_i32 : i32, i32
  }
}

</mosaic_0001>

<bundles_post_ra>
// kernel: ae_forward.1
= control target key start
LH: loop header
LB: loop body
LE: loop exit
PB: predicated region body
PF: predicated region fallthrough
CT: control target
= control target key end

     0   :  { %v620_v1 = vmov 0.0   ;;  %vm621_vm0 = vmmov 0   ;;  %v622_v54 = vmov 0   ;;  %v339_v63 = vlaneseq  ;;  %s813_s1 = inlined_call_operand.vmem [shape: bf16[256,128], index: 1, kind: input, shape index: {}]   ;;  %s814_s0 = inlined_call_operand.vmem [shape: f32[8,256], index: 0, kind: input, shape index: {}]   ;;  %s815_s3 = inlined_call_operand.vmem [shape: bf16[128,128], index: 3, kind: input, shape index: {}]   ;;  %s816_s5 = inlined_call_operand.vmem [shape: bf16[128,256], index: 5, kind: input, shape index: {}]   ;;  %s817_s2 = inlined_call_operand.vmem [shape: f32[1,128], index: 2, kind: input, shape index: {}]   ;;  %s818_s4 = inlined_call_operand.vmem [shape: f32[1,128], index: 4, kind: input, shape index: {}]   ;;  %s819_s6 = inlined_call_operand.vmem [shape: f32[1,256], index: 6, kind: input, shape index: {}]   ;;  %s820_s7 = inlined_call_operand.vmem [shape: f32[8,256], index: 7, kind: output, shape index: {}]  }
   0x1   :  { %v572_v0 = vld [vmem:[%s813_s1 + $0x78] sm:$0xff]   ;;  %549 = vmatprep.subr.bf16.mxu1 %v620_v1  ;;  %v574_v3 = vld [vmem:[%s813_s1 + $0x70] sm:$0xff]   ;;  %v576_v5 = vld [vmem:[%s813_s1 + $0x68] sm:$0xff]   ;;  %565 = vmatprep.mubr.msk.bf16.mxu1 %vm621_vm0, %v620_v1 }
   0x2   :  { %v573_v2 = vld [vmem:[%s813_s1 + $0x38] sm:$0xff]   ;;  %518 = vmatprep.subr.bf16.mxu0 %v572_v0  ;;  %v575_v4 = vld [vmem:[%s813_s1 + $0x30] sm:$0xff]   ;;  %v577_v6 = vld [vmem:[%s813_s1 + $0x28] sm:$0xff]   ;;  %v340_v0 = vshrl.u32 %v339_v63, 7 }
   0x3   :  { %519 = vmatpush3.bf16.msra.mxu0 %v573_v2  ;;  %v578_v7 = vld [vmem:[%s813_s1 + $0x60] sm:$0xff]   ;;  %v580_v9 = vld [vmem:[%s813_s1 + $0x58] sm:$0xff]   ;;  %v582_v11 = vld [vmem:[%s813_s1 + $0x50] sm:$0xff]  }
   0x4   :  { %520 = vmatprep.subr.bf16.mxu0 %v574_v3  ;;  %v579_v8 = vld [vmem:[%s813_s1 + $0x20] sm:$0xff]   ;;  %v581_v10 = vld [vmem:[%s813_s1 + $0x18] sm:$0xff]   ;;  %v28_v12 = vld [vmem:[%s814_s0 + $0x8] sm:$0xff]  ;;  %v345_v3 = vsub.s32 1, %v340_v0 }
   0x5   :  { %v30_v13 = vpack.c.bf16 %v28_v12, %v28_v12  ;;  %v588_v14 = vld [vmem:[%s815_s3 + $0x38] sm:$0xff]   ;;  %v583_v15 = vld [vmem:[%s813_s1 + $0x10] sm:$0xff]   ;;  %v584_v16 = vld [vmem:[%s813_s1 + $0x48] sm:$0xff]  }
   0x6   :  { %550 = vmatpush3.bf16.msra.mxu1 %v588_v14  ;;  %v589_v17 = vld [vmem:[%s815_s3 + $0x30] sm:$0xff]   ;;  %v585_v18 = vld [vmem:[%s813_s1 + $0x8] sm:$0xff]   ;;  %v586_v19 = vld [vmem:[%s813_s1 + $0x40] sm:$0xff]  }
   0x7   :  { %521 = vmatpush3.bf16.msra.mxu0 %v575_v4  ;;  %198 = vmatprep.mubr.bf16.mxu0 %v30_v13  ;;  %v590_v20 = vld [vmem:[%s815_s3 + $0x28] sm:$0xff]   ;;  %v587_v21 = vld [vmem:[%s813_s1] sm:$0xff]   ;;  %v592_v25 = vld [vmem:[%s815_s3 + $0x18] sm:$0xff]  }
   0x8   :  { %522 = vmatprep.subr.bf16.mxu0 %v576_v5  ;;  %551 = vmatprep.subr.bf16.mxu1 %v620_v1  ;;  %v27_v22 = vld [vmem:[%s814_s0] sm:$0xff]  ;;  %v593_v26 = vld [vmem:[%s815_s3 + $0x10] sm:$0xff]   ;;  %v594_v27 = vld [vmem:[%s815_s3 + $0x8] sm:$0xff]  }
   0x9   :  { %v591_v23 = vld [vmem:[%s815_s3 + $0x20] sm:$0xff]   ;;  %v29_v24 = vpack.c.bf16 %v27_v22, %v27_v22  ;;  %v596_v29 = vld [vmem:[%s816_s5 + $0x70] ss:$8 sps:$4 sm:$0xff]   ;;  %v598_v30 = vld [vmem:[%s816_s5 + $0x74] ss:$8 sps:$4 sm:$0xff]  }
   0xa   :  { %552 = vmatpush3.bf16.msra.mxu1 %v589_v17  ;;  %v595_v28 = vld [vmem:[%s815_s3] sm:$0xff]   ;;  %v604_v33 = vld [vmem:[%s816_s5 + $0x54] ss:$8 sps:$4 sm:$0xff]   ;;  %v602_v34 = vld [vmem:[%s816_s5 + $0x50] ss:$8 sps:$4 sm:$0xff]  }
   0xb   :  { %523 = vmatpush3.bf16.msra.mxu0 %v577_v6  ;;  %553 = vmatprep.subr.bf16.mxu1 %v620_v1  ;;  %v601_v31 = vld [vmem:[%s816_s5 + $0x64] ss:$8 sps:$4 sm:$0xff]   ;;  %v599_v32 = vld [vmem:[%s816_s5 + $0x60] ss:$8 sps:$4 sm:$0xff]   ;;  %v610_v37 = vld [vmem:[%s816_s5 + $0x34] ss:$8 sps:$4 sm:$0xff]  }
   0xc   :  { %524 = vmatprep.subr.bf16.mxu0 %v578_v7  ;;  %v607_v35 = vld [vmem:[%s816_s5 + $0x44] ss:$8 sps:$4 sm:$0xff]   ;;  %v605_v36 = vld [vmem:[%s816_s5 + $0x40] ss:$8 sps:$4 sm:$0xff]   ;;  %v608_v38 = vld [vmem:[%s816_s5 + $0x30] ss:$8 sps:$4 sm:$0xff]  }
   0xd   :  { %v613_v39 = vld [vmem:[%s816_s5 + $0x24] ss:$8 sps:$4 sm:$0xff]   ;;  %v611_v40 = vld [vmem:[%s816_s5 + $0x20] ss:$8 sps:$4 sm:$0xff]   ;;  %v616_v41 = vld [vmem:[%s816_s5 + $0x14] ss:$8 sps:$4 sm:$0xff]  }
   0xe   :  { %554 = vmatpush3.bf16.msra.mxu1 %v590_v20  ;;  %v614_v42 = vld [vmem:[%s816_s5 + $0x10] ss:$8 sps:$4 sm:$0xff]   ;;  %v476_v44 = vld [vmem:[%s817_s2] ss:$0 sm:$0xff]  ;;  %v619_v52 = vld [vmem:[%s816_s5 + $0x4] ss:$8 sps:$4 sm:$0xff]  }
   0xf   :  { %525 = vmatpush3.bf16.msra.mxu0 %v579_v8  ;;  %555 = vmatprep.subr.bf16.mxu1 %v620_v1  ;;  %v617_v53 = vld [vmem:[%s816_s5] ss:$8 sps:$4 sm:$0xff]  }
  0x10   :  { %526 = vmatprep.subr.bf16.mxu0 %v580_v9  ;;  %v493_v55 = vld [vmem:[%s818_s4] ss:$0 sm:$0xff] }
  0x11   :  { %v337_v2 = vld [vmem:[%s819_s6] sm:$0x3] }
  0x12   :  { %556 = vmatpush3.bf16.msra.mxu1 %v591_v23  ;;  %v346_v5 = vrot.slane %v337_v2, %v345_v3 }
  0x13   :  { %527 = vmatpush3.bf16.msra.mxu0 %v581_v10  ;;  %557 = vmatprep.subr.bf16.mxu1 %v620_v1 }
  0x14   :  { %528 = vmatprep.subr.bf16.mxu0 %v582_v11 }
  0x16   :  { %558 = vmatpush3.bf16.msra.mxu1 %v592_v25 }
  0x17   :  { %529 = vmatpush3.bf16.msra.mxu0 %v583_v15  ;;  %559 = vmatprep.subr.bf16.mxu1 %v620_v1 }
  0x18   :  { %530 = vmatprep.subr.bf16.mxu0 %v584_v16 }
  0x1a   :  { %560 = vmatpush3.bf16.msra.mxu1 %v593_v26 }
  0x1b   :  { %531 = vmatpush3.bf16.msra.mxu0 %v585_v18  ;;  %561 = vmatprep.subr.bf16.mxu1 %v620_v1 }
  0x1c   :  { %532 = vmatprep.subr.bf16.mxu0 %v586_v19 }
  0x1e   :  { %562 = vmatpush3.bf16.msra.mxu1 %v594_v27 }
  0x1f   :  { %533 = vmatpush3.bf16.msra.mxu0 %v587_v21  ;;  %563 = vmatprep.subr.bf16.mxu1 %v620_v1  ;;  %v341_v1 = vsub.s32 0, %v340_v0 }
  0x20   :  { %429 = vmatprep.subr.bf16.mxu0 %v598_v30 }
  0x21   :  { %v342_v4 = vrot.slane %v337_v2, %v341_v1 }
  0x22   :  { %199 = vmatmul.mubr.bf16.vlgmr.msra.gmra.mxu0 %v29_v24  ;;  %564 = vmatpush3.bf16.msra.mxu1 %v595_v28 }
  0x23   :  { %430 = vmatpush1.bf16.msra.mxu0 %v596_v29  ;;  %461 = vmatprep.mubr.bf16.mxu0 %v622_v54 }
  0x24   :  { %431 = vmatprep.subr.bf16.mxu0 %v601_v31 }
  0x27   :  { %432 = vmatpush1.bf16.msra.mxu0 %v599_v32 }
  0x28   :  { %433 = vmatprep.subr.bf16.mxu0 %v604_v33 }
  0x2b   :  { %434 = vmatpush1.bf16.msra.mxu0 %v602_v34 }
  0x2c   :  { %435 = vmatprep.subr.bf16.mxu0 %v607_v35 }
  0x2f   :  { %436 = vmatpush1.bf16.msra.mxu0 %v605_v36 }
  0x30   :  { %437 = vmatprep.subr.bf16.mxu0 %v610_v37 }
  0x33   :  { %438 = vmatpush1.bf16.msra.mxu0 %v608_v38 }
  0x34   :  { %439 = vmatprep.subr.bf16.mxu0 %v613_v39 }
  0x37   :  { %440 = vmatpush1.bf16.msra.mxu0 %v611_v40 }
  0x38   :  { %441 = vmatprep.subr.bf16.mxu0 %v616_v41 }
  0x3b   :  { %442 = vmatpush1.bf16.msra.mxu0 %v614_v42 }
  0x3c   :  { %443 = vmatprep.subr.bf16.mxu0 %v619_v52 }
  0x3f   :  { %444 = vmatpush1.bf16.msra.mxu0 %v617_v53 }
  0xe2   :  { %v534_v43 = vpop.f32.mrf.mxu0 }
  0xe4   :  { %v535_v45 = vpop.f32.mrf.mxu0 }
  0xe5   :  { %v536_v46 = vadd.f32 %v535_v45, %v534_v43 }
  0xe6   :  { %v537_v47 = vpop.f32.mrf.mxu0 }
  0xe7   :  { %v201_v48 = vadd.f32 %v536_v46, %v476_v44 }
  0xe8   :  { %v538_v49 = vpop.f32.mrf.mxu0 }
  0xe9   :  { %v206_v50 = vmax.f32 %v201_v48, 0.0 }
  0xeb   :  { %v207_v51 = vpack.c.bf16 %v206_v50, %v206_v50 }
  0xed   :  { %566 = vmatmul.mubr.bf16.vlgmr.msra.gmra.mxu1 %v207_v51 }
 0x1ad   :  { %v313_v56 = vpop.f32.mrf.mxu1 }
 0x1ae   :  { %v314_v57 = vadd.f32 %v493_v55, %v313_v56 }
 0x1af   :  { %v567_v58 = vpop.f32.mrf.mxu1 }
 0x1b0   :  { %v319_v59 = vmax.f32 %v314_v57, 0.0 }
 0x1b1   :  { %v316_v60 = vpop.f32.mrf.mxu1 }
 0x1b2   :  { %v320_v61 = vpack.c.bf16 %v319_v59, %v319_v59 }
 0x1b3   :  { %v568_v62 = vpop.f32.mrf.mxu1 }
 0x1b4   :  { %462 = vmatmul.mubr.bf16.vlgmr.msra.gmra.mxu0 %v320_v61 }
 0x274   :  { %v463_v6 = vpop.f32.mrf.mxu0 }
 0x275   :  { %v464_v7 = vadd.f32 %v463_v6, %v342_v4 }
 0x276   :  { %v465_v8 = vpop.f32.mrf.mxu0 }
 0x277   :  { %470 = vst [vmem:[%s820_s7] sm:$0xff] %v464_v7  ;;  %v466_v9 = vadd.f32 %v465_v8, %v346_v5 }
 0x278   :  { %v467_v10 = vpop.f32.mrf.mxu0 }
 0x279   :  { %471 = vst [vmem:[%s820_s7 + $0x8] sm:$0xff] %v466_v9 }
 0x27a   :  { %v468_v11 = vpop.f32.mrf.mxu0 }

</bundles_post_ra>
